<compile_context>
chip_gen: v5e
topology: v5e:2x2
jax: 0.10.0
libtpu: 0.0.40
codegen_flags: <defaults>
</compile_context>

<pallas_src>
import functools

import jax
import jax.numpy as jnp
from jax.experimental import pallas as pl
from jax.experimental.pallas import tpu as pltpu

_LANES = 128


def _round_up(n, m):
    return pl.cdiv(n, m) * m


# ----------------------------------------------------------------------------
# Forward: fused 3-layer MLP (fc1 -> relu -> fc2 -> relu -> fc3)
# ----------------------------------------------------------------------------
def _dqn_forward_kernel(x_ref, w1_ref, b1_ref, w2_ref, b2_ref, w3_ref, b3_ref,
                        o_ref):
    x = x_ref[...].astype(jnp.float32)
    h = jnp.dot(x, w1_ref[...], preferred_element_type=jnp.float32) + b1_ref[...]
    h = jnp.maximum(h, 0.0)
    h = jnp.dot(h, w2_ref[...], preferred_element_type=jnp.float32) + b2_ref[...]
    h = jnp.maximum(h, 0.0)
    out = jnp.dot(h, w3_ref[...], preferred_element_type=jnp.float32) + b3_ref[...]
    o_ref[...] = out.astype(o_ref.dtype)          # full 128-lane (unmasked) store


def dqn_forward(params, x, *, block_b=2048):
    """x: (B, num_inputs) float32.  Returns (B, num_outputs) Q-values."""
    w1, b1 = params["fc1"]["w"], params["fc1"]["b"]
    w2, b2 = params["fc2"]["w"], params["fc2"]["b"]
    w3, b3 = params["fc3"]["w"], params["fc3"]["b"]
    batch, d_in = x.shape
    d_out = w3.shape[1]

    # Lane-dense output: pad the last layer to a 128-lane-wide output so the
    # final store is unmasked and the writeback DMA is lane-efficient.  w3/b3
    # are tiny (<= 32 KiB padded) so this wrapper pad is negligible.
    d_out_p = _round_up(d_out, _LANES)
    if d_out_p != d_out:
        w3p = jnp.pad(w3, ((0, 0), (0, d_out_p - d_out)))
        b3p = jnp.pad(b3, ((0, 0), (0, d_out_p - d_out)))
    else:
        w3p, b3p = w3, b3

    # Batch tiling.  No wrapper-side padding of x: Pallas handles the ragged
    # tail block (out-of-bounds rows are never written back).  For large
    # batches keep >= 2 grid steps so v7x's 2 TensorCores can both be used.
    if batch <= 8:
        bb = batch                                   # single full block
    else:
        bb = min(block_b, _round_up(pl.cdiv(batch, 2), 8))
    grid = (pl.cdiv(batch, bb),)

    out = pl.pallas_call(
        _dqn_forward_kernel,
        out_shape=jax.ShapeDtypeStruct((batch, d_out_p), x.dtype),
        grid=grid,
        in_specs=[
            pl.BlockSpec((bb, d_in), lambda i: (i, 0)),     # x: batch-tiled
            pl.BlockSpec(w1.shape, lambda i: (0, 0)),       # weights stay resident
            pl.BlockSpec(b1.shape, lambda i: (0, 0)),
            pl.BlockSpec(w2.shape, lambda i: (0, 0)),
            pl.BlockSpec(b2.shape, lambda i: (0, 0)),
            pl.BlockSpec(w3p.shape, lambda i: (0, 0)),
            pl.BlockSpec(b3p.shape, lambda i: (0, 0)),
        ],
        out_specs=pl.BlockSpec((bb, d_out_p), lambda i: (i, 0)),
        compiler_params=pltpu.CompilerParams(
            dimension_semantics=("parallel",)),
    )(x, w1, b1, w2, b2, w3p, b3p)
    return out[:, :d_out]


# ----------------------------------------------------------------------------
# updateFrom: Polyak soft update  p <- tau * p_src + (1 - tau) * p
# One grid-less pallas_call over ALL parameter leaves (total params ~22 KB),
# each leaf aliased in-place, no flatten/concat/pad repacking.
# ----------------------------------------------------------------------------
def _polyak_multi_kernel(n_leaves, tau_ref, *refs):
    t = tau_ref[0]                                   # f32 scalar from SMEM
    my_refs = refs[:n_leaves]
    src_refs = refs[n_leaves:2 * n_leaves]
    out_refs = refs[2 * n_leaves:]
    for m, s, o in zip(my_refs, src_refs, out_refs):
        mv = m[...].astype(jnp.float32)
        sv = s[...].astype(jnp.float32)
        o[...] = (t * sv + (1.0 - t) * mv).astype(o.dtype)


def dqn_update_from(my_params, source_params, tau=0.001):
    """Polyak-average every parameter leaf in a single kernel call."""
    treedef = jax.tree_util.tree_structure(my_params)
    leaves_my = jax.tree_util.tree_leaves(my_params)
    leaves_src = jax.tree_util.tree_leaves(source_params)
    assert len(leaves_my) == len(leaves_src)
    for a, b in zip(leaves_my, leaves_src):
        assert a.shape == b.shape and a.dtype == b.dtype
    n = len(leaves_my)

    tau_arr = jnp.asarray([tau], dtype=jnp.float32)
    vmem_spec = pl.BlockSpec(memory_space=pltpu.MemorySpace.VMEM)

    new_leaves = pl.pallas_call(
        functools.partial(_polyak_multi_kernel, n),
        out_shape=tuple(jax.ShapeDtypeStruct(l.shape, l.dtype) for l in leaves_my),
        in_specs=([pl.BlockSpec(memory_space=pltpu.MemorySpace.SMEM)]    # tau
                  + [vmem_spec] * (2 * n)),                              # my, src
        out_specs=tuple(vmem_spec for _ in range(n)),
        # In-place update of each "my" leaf: input i+1 -> output i.  (When the
        # caller donates its buffers this is a true in-place update; otherwise
        # XLA preserves the caller's copy.)
        input_output_aliases={i + 1: i for i in range(n)},
    )(tau_arr, *leaves_my, *leaves_src)
    return jax.tree_util.tree_unflatten(treedef, list(new_leaves))


# ----------------------------------------------------------------------------
# pure-JAX references + demo
# ----------------------------------------------------------------------------
def _forward_ref(params, x):
    h = jnp.maximum(x @ params["fc1"]["w"] + params["fc1"]["b"], 0.0)
    h = jnp.maximum(h @ params["fc2"]["w"] + params["fc2"]["b"], 0.0)
    return h @ params["fc3"]["w"] + params["fc3"]["b"]


def _init_linear(kw, kb, fan_in, fan_out):
    bound = 1.0 / (fan_in ** 0.5)
    w = jax.random.uniform(kw, (fan_in, fan_out), jnp.float32, -bound, bound)
    b = jax.random.uniform(kb, (1, fan_out), jnp.float32, -bound, bound)
    return {"w": w, "b": b}


if __name__ == "__main__":
    key = jax.random.PRNGKey(0)
    ks = jax.random.split(key, 14)

    num_inputs, num_outputs = 16, 4
    batch = 2
    hidden = 64

    params = {
        "fc1": _init_linear(ks[0], ks[1], num_inputs, hidden),
        "fc2": _init_linear(ks[2], ks[3], hidden, hidden),
        "fc3": _init_linear(ks[4], ks[5], hidden, num_outputs),
    }
    target_params = {
        "fc1": _init_linear(ks[6], ks[7], num_inputs, hidden),
        "fc2": _init_linear(ks[8], ks[9], hidden, hidden),
        "fc3": _init_linear(ks[10], ks[11], hidden, num_outputs),
    }

    # Forward pass.
    x = jax.random.normal(ks[12], (batch, num_inputs), dtype=jnp.float32)
    y = jax.block_until_ready(dqn_forward(params, x))
    y_ref = _forward_ref(params, x)
    assert y.shape == (batch, num_outputs) and y.dtype == x.dtype
    assert jnp.allclose(y, y_ref, atol=1e-5, rtol=1e-5), "forward mismatch"

    # Polyak soft update (updateFrom).  Compute the reference first so the
    # check is independent of in-place aliasing behavior.
    tau = 0.001
    ref_params = jax.tree_util.tree_map(
        lambda m, s: tau * s + (1.0 - tau) * m, params, target_params)
    new_params = jax.block_until_ready(
        dqn_update_from(params, target_params, tau=tau))
    for got, want in zip(jax.tree_util.tree_leaves(new_params),
                         jax.tree_util.tree_leaves(ref_params)):
        assert jnp.allclose(got, want, atol=1e-6), "polyak update mismatch"

    print("KERNEL_OK")
</pallas_src>

<mosaic_0001>
module attributes {stable_mosaic.version = 11 : i64} {
  func.func @_dqn_forward_kernel(%arg0: i32, %arg1: memref<2x16xf32, #tpu.memory_space<vmem>>, %arg2: memref<16x64xf32, #tpu.memory_space<vmem>>, %arg3: memref<1x64xf32, #tpu.memory_space<vmem>>, %arg4: memref<64x64xf32, #tpu.memory_space<vmem>>, %arg5: memref<1x64xf32, #tpu.memory_space<vmem>>, %arg6: memref<64x128xf32, #tpu.memory_space<vmem>>, %arg7: memref<1x128xf32, #tpu.memory_space<vmem>>, %arg8: memref<2x128xf32, #tpu.memory_space<vmem>>) attributes {dimension_semantics = [#tpu.dimension_semantics<parallel>], iteration_bounds = array<i64: 1>, scalar_prefetch = 0 : i64, scratch_operands = 0 : i64, tpu.core_type = #tpu.core_type<tc>, window_params = [{transform_indices = @transform_0, window_bounds = array<i64: 2, 16>}, {pipeline_mode = #tpu.pipeline_mode<synchronous>, transform_indices = @transform_1, window_bounds = array<i64: 16, 64>}, {pipeline_mode = #tpu.pipeline_mode<synchronous>, transform_indices = @transform_2, window_bounds = array<i64: 1, 64>}, {pipeline_mode = #tpu.pipeline_mode<synchronous>, transform_indices = @transform_3, window_bounds = array<i64: 64, 64>}, {pipeline_mode = #tpu.pipeline_mode<synchronous>, transform_indices = @transform_4, window_bounds = array<i64: 1, 64>}, {pipeline_mode = #tpu.pipeline_mode<synchronous>, transform_indices = @transform_5, window_bounds = array<i64: 64, 128>}, {pipeline_mode = #tpu.pipeline_mode<synchronous>, transform_indices = @transform_6, window_bounds = array<i64: 1, 128>}, {transform_indices = @transform_7, window_bounds = array<i64: 2, 128>}]} {
    %c0 = arith.constant 0 : index
    %c0_0 = arith.constant 0 : index
    %0 = vector.load %arg1[%c0, %c0_0] : memref<2x16xf32, #tpu.memory_space<vmem>>, vector<2x16xf32>
    %c0_1 = arith.constant 0 : index
    %c0_2 = arith.constant 0 : index
    %1 = vector.load %arg2[%c0_1, %c0_2] : memref<16x64xf32, #tpu.memory_space<vmem>>, vector<16x64xf32>
    %cst = arith.constant dense<0.000000e+00> : vector<2x64xf32>
    %2 = tpu.matmul %0, %1, %cst {dimension_numbers = #tpu.dot_dimension_numbers<[1], [0], [0], [1], [0, 0, 1, 1], [], []>} : vector<2x16xf32>, vector<16x64xf32>, vector<2x64xf32> -> vector<2x64xf32>
    %c0_3 = arith.constant 0 : index
    %c0_4 = arith.constant 0 : index
    %3 = vector.load %arg3[%c0_3, %c0_4] : memref<1x64xf32, #tpu.memory_space<vmem>>, vector<1x64xf32>
    %4 = vector.broadcast %3 : vector<1x64xf32> to vector<2x64xf32>
    %5 = arith.addf %2, %4 : vector<2x64xf32>
    %cst_5 = arith.constant 0.000000e+00 : f32
    %6 = vector.broadcast %cst_5 : f32 to vector<2x64xf32>
    %7 = arith.maximumf %5, %6 : vector<2x64xf32>
    %c0_6 = arith.constant 0 : index
    %c0_7 = arith.constant 0 : index
    %8 = vector.load %arg4[%c0_6, %c0_7] : memref<64x64xf32, #tpu.memory_space<vmem>>, vector<64x64xf32>
    %cst_8 = arith.constant dense<0.000000e+00> : vector<2x64xf32>
    %9 = tpu.matmul %7, %8, %cst_8 {dimension_numbers = #tpu.dot_dimension_numbers<[1], [0], [0], [1], [0, 0, 1, 1], [], []>} : vector<2x64xf32>, vector<64x64xf32>, vector<2x64xf32> -> vector<2x64xf32>
    %c0_9 = arith.constant 0 : index
    %c0_10 = arith.constant 0 : index
    %10 = vector.load %arg5[%c0_9, %c0_10] : memref<1x64xf32, #tpu.memory_space<vmem>>, vector<1x64xf32>
    %11 = vector.broadcast %10 : vector<1x64xf32> to vector<2x64xf32>
    %12 = arith.addf %9, %11 : vector<2x64xf32>
    %cst_11 = arith.constant 0.000000e+00 : f32
    %13 = vector.broadcast %cst_11 : f32 to vector<2x64xf32>
    %14 = arith.maximumf %12, %13 : vector<2x64xf32>
    %c0_12 = arith.constant 0 : index
    %c0_13 = arith.constant 0 : index
    %15 = vector.load %arg6[%c0_12, %c0_13] : memref<64x128xf32, #tpu.memory_space<vmem>>, vector<64x128xf32>
    %cst_14 = arith.constant dense<0.000000e+00> : vector<2x128xf32>
    %16 = tpu.matmul %14, %15, %cst_14 {dimension_numbers = #tpu.dot_dimension_numbers<[1], [0], [0], [1], [0, 0, 1, 1], [], []>} : vector<2x64xf32>, vector<64x128xf32>, vector<2x128xf32> -> vector<2x128xf32>
    %c0_15 = arith.constant 0 : index
    %c0_16 = arith.constant 0 : index
    %17 = vector.load %arg7[%c0_15, %c0_16] : memref<1x128xf32, #tpu.memory_space<vmem>>, vector<1x128xf32>
    %18 = vector.broadcast %17 : vector<1x128xf32> to vector<2x128xf32>
    %19 = arith.addf %16, %18 : vector<2x128xf32>
    %c0_17 = arith.constant 0 : index
    %c0_18 = arith.constant 0 : index
    %20 = vector.load %arg8[%c0_17, %c0_18] : memref<2x128xf32, #tpu.memory_space<vmem>>, vector<2x128xf32>
    tpu.vector_store %arg8[%c0_17, %c0_18], %19 {strides = array<i32>} : memref<2x128xf32, #tpu.memory_space<vmem>>, vector<2x128xf32>,
    return
  }
  func.func @transform_0(%arg0: i32) -> (i32, i32) {
    %c0_i32 = arith.constant 0 : i32
    %c0_i32_0 = arith.constant 0 : i32
    return %arg0, %c0_i32 : i32, i32
  }
  func.func @transform_1(%arg0: i32) -> (i32, i32) {
    %c0_i32 = arith.constant 0 : i32
    %c0_i32_0 = arith.constant 0 : i32
    %c0_i32_1 = arith.constant 0 : i32
    return %c0_i32, %c0_i32_0 : i32, i32
  }
  func.func @transform_2(%arg0: i32) -> (i32, i32) {
    %c0_i32 = arith.constant 0 : i32
    %c0_i32_0 = arith.constant 0 : i32
    %c0_i32_1 = arith.constant 0 : i32
    return %c0_i32, %c0_i32_0 : i32, i32
  }
  func.func @transform_3(%arg0: i32) -> (i32, i32) {
    %c0_i32 = arith.constant 0 : i32
    %c0_i32_0 = arith.constant 0 : i32
    %c0_i32_1 = arith.constant 0 : i32
    return %c0_i32, %c0_i32_0 : i32, i32
  }
  func.func @transform_4(%arg0: i32) -> (i32, i32) {
    %c0_i32 = arith.constant 0 : i32
    %c0_i32_0 = arith.constant 0 : i32
    %c0_i32_1 = arith.constant 0 : i32
    return %c0_i32, %c0_i32_0 : i32, i32
  }
  func.func @transform_5(%arg0: i32) -> (i32, i32) {
    %c0_i32 = arith.constant 0 : i32
    %c0_i32_0 = arith.constant 0 : i32
    %c0_i32_1 = arith.constant 0 : i32
    return %c0_i32, %c0_i32_0 : i32, i32
  }
  func.func @transform_6(%arg0: i32) -> (i32, i32) {
    %c0_i32 = arith.constant 0 : i32
    %c0_i32_0 = arith.constant 0 : i32
    %c0_i32_1 = arith.constant 0 : i32
    return %c0_i32, %c0_i32_0 : i32, i32
  }
  func.func @transform_7(%arg0: i32) -> (i32, i32) {
    %c0_i32 = arith.constant 0 : i32
    %c0_i32_0 = arith.constant 0 : i32
    return %arg0, %c0_i32 : i32, i32
  }
}

</mosaic_0001>

<bundles_post_ra>
// kernel: tpu_custom_call.1
= control target key start
LH: loop header
LB: loop body
LE: loop exit
PB: predicated region body
PF: predicated region fallthrough
CT: control target
= control target key end

     0   :  { %12 = vsyncpa [#allocation3], 0  ;;  %s424_s0 = inlined_call_operand.hbm [shape: f32[2,16], index: 0, kind: input, shape index: {}]   ;;  %s425_s1 = inlined_call_operand.hbm [shape: f32[16,64], index: 1, kind: input, shape index: {}]   ;;  %s426_s2 = inlined_call_operand.vmem [shape: f32[1,64], index: 2, kind: input, shape index: {}]   ;;  %s427_s3 = inlined_call_operand.hbm [shape: f32[64,64], index: 3, kind: input, shape index: {}]   ;;  %s428_s4 = inlined_call_operand.vmem [shape: f32[1,64], index: 4, kind: input, shape index: {}]   ;;  %s429_s5 = inlined_call_operand.hbm [shape: f32[64,128], index: 5, kind: input, shape index: {}]   ;;  %s430_s6 = inlined_call_operand.vmem [shape: f32[1,128], index: 6, kind: input, shape index: {}]   ;;  %s431_s7 = inlined_call_operand.hbm [shape: f32[2,128], index: 7, kind: output, shape index: {}]  }
   0x1   :  { %13 = vsyncpa [#allocation6], 0 }
   0x2   :  { %14 = vsyncpa [#allocation9], 0  ;;  %s31_s26 = sshll.u32 %s425_s1, 4  ;;  %s32_s26 = int_to_ptr.hbm [resolvable:$true] %s31_s26 }
   0x3   :  { %15 = vsyncpa [#allocation4], 0  ;;  %s353_s27 = smov [#allocation5]   ;;  %s21_s8 = sshll.u32 %s424_s0, 4  ;;  %s22_s8 = int_to_ptr.hbm [resolvable:$true] %s21_s8 }
   0x4   :  { %s33_s28 = sshll.u32 %s353_s27, 4  ;;  %s354_s9 = smov 128   ;;  %s34_s28 = int_to_ptr.vmem [resolvable:$true] %s33_s28 }
   0x5   :  { %s355_s10 = smov 8   ;;  %s356_s11 = smov [#allocation2]  }
   0x6   :  { %39 = dma.hbm_to_vmem [thread:$0]  %s32_s26, 256, %s34_s28, [#allocation6], %s354_s9, %s354_s9, %s355_s10  }
   0x7   :  { %s23_s12 = sshll.u32 %s356_s11, 4  ;;  %s46_s15 = sshll.u32 %s427_s3, 4  ;;  %s24_s12 = int_to_ptr.vmem [resolvable:$true] %s23_s12  ;;  %s47_s15 = int_to_ptr.hbm [resolvable:$true] %s46_s15 }
   0x8   :  { %26 = dma.hbm_to_vmem [thread:$0]  %s22_s8, 32, %s24_s12, [#allocation3]  }
   0x9   :  { %s61_s17 = sshll.u32 %s429_s5, 4  ;;  %s357_s18 = smov [#allocation7]   ;;  %s62_s17 = int_to_ptr.hbm [resolvable:$true] %s61_s17 }
   0xa   :  { %s48_s19 = sshll.u32 %s357_s18, 4  ;;  %s358_s0 = smov [#allocation8]   ;;  %s49_s19 = int_to_ptr.vmem [resolvable:$true] %s48_s19 }
   0xb   :  { %54 = dma.hbm_to_vmem [thread:$0]  %s47_s15, 1024, %s49_s19, [#allocation6], %s354_s9, %s354_s9, %s355_s10  }
   0xc   :  { %s63_s20 = sshll.u32 %s358_s0, 4  ;;  %s64_s20 = int_to_ptr.vmem [resolvable:$true] %s63_s20 }
   0xd   :  { %69 = dma.hbm_to_vmem [thread:$0]  %s62_s17, 1024, %s64_s20, [#allocation9], %s354_s9, %s354_s9, %s355_s10  }
   0xe   :  { %345 = dma.done.wait [#allocation3], 32  }
   0xf   :  { %346 = vsyncadd [#allocation3], 4294967264 }
  0x10   :  { %347 = dma.done.wait [#allocation6], 1280  }
  0x11   :  { %348 = vsyncadd [#allocation6], 4294966016 }
  0x12   :  { %349 = dma.done.wait [#allocation9], 1024  }
  0x13   :  { %350 = vsyncadd [#allocation9], 4294966272  ;;  %v90_v0 = vld [vmem:[#allocation5 + $0x8] sm:$0xff]  ;;  %v89_v1 = vld [vmem:[#allocation5] sm:$0xff]  ;;  %vm95_vm0 = vcmask 130048   ;;  %vm132_vm1 = vcmask 523264  }
  0x14   :  { %113 = vmatpush.msra.mxu0 %v90_v0  ;;  %v88_v2 = vld [vmem:[#allocation2] sm:$0x3]  ;;  %v127_v3 = vld [vmem:[#allocation7 + $0x38] sm:$0xff]  ;;  %v126_v4 = vld [vmem:[#allocation7 + $0x30] sm:$0xff]  ;;  %s359_s24 = smov [#allocation10]   ;;  %s200_s28 = sshll.u32 %s431_s7, 4  ;;  %s201_s28 = int_to_ptr.hbm [resolvable:$true] %s200_s28 }
  0x15   :  { %144 = vmatpush.msra.mxu1 %v127_v3  ;;  %v125_v5 = vld [vmem:[#allocation7 + $0x28] sm:$0xff]  ;;  %v124_v6 = vld [vmem:[#allocation7 + $0x20] sm:$0xff]  ;;  %v123_v7 = vld [vmem:[#allocation7 + $0x18] sm:$0xff]  ;;  %s198_s25 = sshll.u32 %s359_s24, 4  ;;  %s199_s25 = int_to_ptr.vmem [resolvable:$true] %s198_s25 }
  0x16   :  { %114 = vmatpush.msra.mxu0 %v89_v1  ;;  %v122_v8 = vld [vmem:[#allocation7 + $0x10] sm:$0xff]  ;;  %v121_v9 = vld [vmem:[#allocation7 + $0x8] sm:$0xff]  ;;  %v120_v10 = vld [vmem:[#allocation7] sm:$0xff] }
  0x17   :  { %212 = vmatmul.msk.f32.vlgmr.msra.gmra.mxu0 %vm95_vm0, %v88_v2  ;;  %145 = vmatpush.msra.mxu1 %v126_v4  ;;  %v164_v11 = vld [vmem:[#allocation8 + $0x38] sm:$0xff]  ;;  %v163_v12 = vld [vmem:[#allocation8 + $0x30] sm:$0xff]  ;;  %v162_v13 = vld [vmem:[#allocation8 + $0x28] sm:$0xff] }
  0x18   :  { %180 = vmatpush.msra.mxu2 %v164_v11  ;;  %v161_v14 = vld [vmem:[#allocation8 + $0x20] sm:$0xff]  ;;  %v160_v15 = vld [vmem:[#allocation8 + $0x18] sm:$0xff]  ;;  %v222_v16 = vld [vmem:[%s426_s2] ss:$0 sm:$0xff] }
  0x19   :  { %146 = vmatpush.msra.mxu1 %v125_v5  ;;  %v159_v20 = vld [vmem:[#allocation8 + $0x10] sm:$0xff]  ;;  %v158_v21 = vld [vmem:[#allocation8 + $0x8] sm:$0xff]  ;;  %v157_v22 = vld [vmem:[#allocation8] sm:$0xff] }
  0x1a   :  { %181 = vmatpush.msra.mxu2 %v163_v12  ;;  %v223_v23 = vld [vmem:[%s428_s4] ss:$0 sm:$0xff] }
  0x1b   :  { %147 = vmatpush.msra.mxu1 %v124_v6  ;;  %v224_v27 = vld [vmem:[%s430_s6] ss:$0 sm:$0xff] }
  0x1c   :  { %182 = vmatpush.msra.mxu2 %v162_v13 }
  0x1d   :  { %148 = vmatpush.msra.mxu1 %v123_v7 }
  0x1e   :  { %183 = vmatpush.msra.mxu2 %v161_v14 }
  0x1f   :  { %149 = vmatpush.msra.mxu1 %v122_v8 }
  0x20   :  { %184 = vmatpush.msra.mxu2 %v160_v15 }
  0x21   :  { %150 = vmatpush.msra.mxu1 %v121_v9 }
  0x22   :  { %185 = vmatpush.msra.mxu2 %v159_v20 }
  0x23   :  { %151 = vmatpush.msra.mxu1 %v120_v10 }
  0x24   :  { %186 = vmatpush.msra.mxu2 %v158_v21 }
  0x26   :  { %187 = vmatpush.msra.mxu2 %v157_v22 }
  0x94   :  { %v116_v17 = vpop.f32.mrf.mxu0 }
  0x95   :  { %v117_v18 = vadd.f32 %v222_v16, %v116_v17 }
  0x97   :  { %v119_v19 = vmax.f32 %v117_v18, 0.0 }
  0x99   :  { %213 = vmatmul.msk.f32.vlgmr.msra.gmra.mxu1 %vm132_vm1, %v119_v19 }
 0x116   :  { %v153_v24 = vpop.f32.mrf.mxu1 }
 0x117   :  { %v154_v25 = vadd.f32 %v223_v23, %v153_v24 }
 0x119   :  { %v156_v26 = vmax.f32 %v154_v25, 0.0 }
 0x11b   :  { %214 = vmatmul.msk.f32.vlgmr.msra.gmra.mxu2 %vm132_vm1, %v156_v26 }
 0x19e   :  { %v189_v28 = vpop.f32.mrf.mxu2 }
 0x19f   :  { %v190_v29 = vadd.f32 %v224_v27, %v189_v28 }
 0x1a1   :  { %192 = vst [vmem:[#allocation10] sm:$0x3] %v190_v29 }
 0x1a2   :  { %203 = dma.vmem_to_hbm [thread:$0]  %s199_s25, 32, %s201_s28, [#allocation4]  }
 0x1a3   :  { %351 = dma.done.wait [#allocation4], 32  }
 0x1a4   :  { %352 = vsyncadd [#allocation4], 4294967264 }
 0x1a5   :  { %208 = vsyncpa [#allocation3], 1 }
 0x1a6   :  { %209 = vsyncpa [#allocation6], 1 }
 0x1a7   :  { %210 = vsyncpa [#allocation9], 1 }
 0x1a8   :  { %211 = vsyncpa [#allocation4], 1 }

</bundles_post_ra>
